<compile_context>
chip_gen: v7x
topology: tpu7x:2x2x1
jax: 0.10.0
libtpu: 0.0.40
codegen_flags: <defaults>
</compile_context>

<pallas_src>
import functools

import jax
import jax.numpy as jnp
from jax.experimental import pallas as pl
from jax.experimental.pallas import tpu as pltpu


def _round_up(n: int, m: int) -> int:
    return (n + m - 1) // m * m


def bottleneck_kernel(x_ref, w1_ref, b1_ref, w2_ref, b2_ref, w3_ref, b3_ref, o_ref):
    # Entire forward pass fused in one kernel body (per batch tile).
    x = x_ref[...]

    # hidden_layer1: Linear + ReLU (padded H1 lanes stay 0: zero W cols + zero bias + ReLU)
    h1 = jnp.dot(x, w1_ref[...], preferred_element_type=jnp.float32) + b1_ref[...]
    h1 = jnp.maximum(h1, 0.0)

    # hidden_layer2: Linear + ReLU
    h2 = jnp.dot(h1, w2_ref[...], preferred_element_type=jnp.float32) + b2_ref[...]
    h2 = jnp.maximum(h2, 0.0)

    # output_layer: Linear (output dim left unpadded -> no lane masking needed)
    logits = jnp.dot(h2, w3_ref[...], preferred_element_type=jnp.float32) + b3_ref[...]

    # LogSoftmax(dim=-1), numerically stable.
    m = jnp.max(logits, axis=-1, keepdims=True)
    shifted = logits - m
    lse = jnp.log(jnp.sum(jnp.exp(shifted), axis=-1, keepdims=True))
    o_ref[...] = (shifted - lse).astype(o_ref.dtype)


def pad_params(w1, b1, w2, b2, w3, b3):
    """Pad hidden fan-out dims to 128 lanes ONCE (reuse across forward calls).

    Input feature dim and output dim are left unpadded.  Zero-padded weight columns and
    zero biases keep padded hidden lanes exactly 0 through the ReLUs; zero-padded W3 rows
    make those lanes contribute nothing to the logits.
    """
    d_in, h1 = w1.shape
    h2 = w2.shape[1]
    out = w3.shape[1]
    h1_p = _round_up(h1, 128)
    h2_p = _round_up(h2, 128)

    w1p = jnp.zeros((d_in, h1_p), jnp.float32).at[:, :h1].set(w1)
    b1p = jnp.zeros((1, h1_p), jnp.float32).at[:, :h1].set(b1)
    w2p = jnp.zeros((h1_p, h2_p), jnp.float32).at[:h1, :h2].set(w2)
    b2p = jnp.zeros((1, h2_p), jnp.float32).at[:, :h2].set(b2)
    w3p = jnp.zeros((h2_p, out), jnp.float32).at[:h2, :].set(w3)
    b3p = jnp.asarray(b3, jnp.float32).reshape(1, out)
    return w1p, b1p, w2p, b2p, w3p, b3p


def bottleneck_forward(x, w1p, b1p, w2p, b2p, w3p, b3p, *, tb=1024):
    """Forward pass of the bottleneck MLP via a single fused Pallas kernel.

    x   : [B, D_in] float32 (unpadded)
    w*p : pre-padded params from pad_params()
    Returns [B, OUT] float32 log-probabilities.
    """
    B, d_in = x.shape
    h1_p = w1p.shape[1]
    h2_p = w2p.shape[1]
    out = w3p.shape[1]

    x = x.astype(jnp.float32)

    # Batch tile: multiple of 8 (f32 sublane granularity), no larger than needed.
    tb_eff = max(8, min(tb, _round_up(B, 8)))
    grid = (pl.cdiv(B, tb_eff),)  # ragged last block handled by Pallas (rows independent)

    y = pl.pallas_call(
        bottleneck_kernel,
        out_shape=jax.ShapeDtypeStruct((B, out), jnp.float32),
        grid=grid,
        in_specs=[
            pl.BlockSpec((tb_eff, d_in), lambda i: (i, 0)),  # x streams over batch
            pl.BlockSpec((d_in, h1_p), lambda i: (0, 0)),    # W1 (VMEM-resident)
            pl.BlockSpec((1, h1_p), lambda i: (0, 0)),       # b1
            pl.BlockSpec((h1_p, h2_p), lambda i: (0, 0)),    # W2
            pl.BlockSpec((1, h2_p), lambda i: (0, 0)),       # b2
            pl.BlockSpec((h2_p, out), lambda i: (0, 0)),     # W3 (output dim unpadded)
            pl.BlockSpec((1, out), lambda i: (0, 0)),        # b3
        ],
        out_specs=pl.BlockSpec((tb_eff, out), lambda i: (i, 0)),
        compiler_params=pltpu.CompilerParams(
            dimension_semantics=("parallel",)),
    )(x, w1p, b1p, w2p, b2p, w3p, b3p)

    return y


def init_params(key, input_features_dim, hidden_1=100, hidden_2=100, output=12):
    """Deterministic init mimicking PyTorch nn.Linear default (U(-1/sqrt(fan_in), +))."""
    ks = jax.random.split(key, 6)

    def linear(kw, kb, fan_in, fan_out):
        bound = 1.0 / jnp.sqrt(fan_in)
        w = jax.random.uniform(kw, (fan_in, fan_out), jnp.float32, -bound, bound)
        b = jax.random.uniform(kb, (1, fan_out), jnp.float32, -bound, bound)
        return w, b

    w1, b1 = linear(ks[0], ks[1], input_features_dim, hidden_1)
    w2, b2 = linear(ks[2], ks[3], hidden_1, hidden_2)
    w3, b3 = linear(ks[4], ks[5], hidden_2, output)
    return w1, b1, w2, b2, w3, b3


if __name__ == "__main__":
    key = jax.random.PRNGKey(0)
    kx, kp = jax.random.split(key)

    B = 8
    D_IN = 32
    H1, H2, OUT = 100, 100, 12

    x = jax.random.normal(kx, (B, D_IN), dtype=jnp.float32)
    w1, b1, w2, b2, w3, b3 = init_params(kp, D_IN, H1, H2, OUT)

    # Pad params once (outside the per-call forward path).
    padded = pad_params(w1, b1, w2, b2, w3, b3)

    y = bottleneck_forward(x, *padded)
    y = jax.block_until_ready(y)
    assert y.shape == (B, OUT)

    # Sanity check against a pure-JAX reference of the same forward pass.
    h1_ref = jax.nn.relu(x @ w1 + b1)
    h2_ref = jax.nn.relu(h1_ref @ w2 + b2)
    logits_ref = h2_ref @ w3 + b3
    y_ref = jax.nn.log_softmax(logits_ref, axis=-1)
    assert jnp.allclose(y, y_ref, atol=1e-4, rtol=1e-4), "mismatch vs reference"

    print("KERNEL_OK")
</pallas_src>

<mosaic_0001>
module attributes {stable_mosaic.version = 11 : i64} {
  func.func @bottleneck_kernel(%arg0: i32, %arg1: memref<8x32xf32, #tpu.memory_space<vmem>>, %arg2: memref<32x128xf32, #tpu.memory_space<vmem>>, %arg3: memref<1x128xf32, #tpu.memory_space<vmem>>, %arg4: memref<128x128xf32, #tpu.memory_space<vmem>>, %arg5: memref<1x128xf32, #tpu.memory_space<vmem>>, %arg6: memref<128x12xf32, #tpu.memory_space<vmem>>, %arg7: memref<1x12xf32, #tpu.memory_space<vmem>>, %arg8: memref<8x12xf32, #tpu.memory_space<vmem>>) attributes {dimension_semantics = [#tpu.dimension_semantics<parallel>], iteration_bounds = array<i64: 1>, scalar_prefetch = 0 : i64, scratch_operands = 0 : i64, tpu.core_type = #tpu.core_type<tc>, window_params = [{transform_indices = @transform_0, window_bounds = array<i64: 8, 32>}, {pipeline_mode = #tpu.pipeline_mode<synchronous>, transform_indices = @transform_1, window_bounds = array<i64: 32, 128>}, {pipeline_mode = #tpu.pipeline_mode<synchronous>, transform_indices = @transform_2, window_bounds = array<i64: 1, 128>}, {pipeline_mode = #tpu.pipeline_mode<synchronous>, transform_indices = @transform_3, window_bounds = array<i64: 128, 128>}, {pipeline_mode = #tpu.pipeline_mode<synchronous>, transform_indices = @transform_4, window_bounds = array<i64: 1, 128>}, {pipeline_mode = #tpu.pipeline_mode<synchronous>, transform_indices = @transform_5, window_bounds = array<i64: 128, 12>}, {pipeline_mode = #tpu.pipeline_mode<synchronous>, transform_indices = @transform_6, window_bounds = array<i64: 1, 12>}, {transform_indices = @transform_7, window_bounds = array<i64: 8, 12>}]} {
    %c0 = arith.constant 0 : index
    %c0_0 = arith.constant 0 : index
    %0 = vector.load %arg1[%c0, %c0_0] : memref<8x32xf32, #tpu.memory_space<vmem>>, vector<8x32xf32>
    %c0_1 = arith.constant 0 : index
    %c0_2 = arith.constant 0 : index
    %1 = vector.load %arg2[%c0_1, %c0_2] : memref<32x128xf32, #tpu.memory_space<vmem>>, vector<32x128xf32>
    %cst = arith.constant dense<0.000000e+00> : vector<8x128xf32>
    %2 = tpu.matmul %0, %1, %cst {dimension_numbers = #tpu.dot_dimension_numbers<[1], [0], [0], [1], [0, 0, 1, 1], [], []>} : vector<8x32xf32>, vector<32x128xf32>, vector<8x128xf32> -> vector<8x128xf32>
    %c0_3 = arith.constant 0 : index
    %c0_4 = arith.constant 0 : index
    %3 = vector.load %arg3[%c0_3, %c0_4] : memref<1x128xf32, #tpu.memory_space<vmem>>, vector<1x128xf32>
    %4 = vector.broadcast %3 : vector<1x128xf32> to vector<8x128xf32>
    %5 = arith.addf %2, %4 : vector<8x128xf32>
    %cst_5 = arith.constant 0.000000e+00 : f32
    %6 = vector.broadcast %cst_5 : f32 to vector<8x128xf32>
    %7 = arith.maximumf %5, %6 : vector<8x128xf32>
    %c0_6 = arith.constant 0 : index
    %c0_7 = arith.constant 0 : index
    %8 = vector.load %arg4[%c0_6, %c0_7] : memref<128x128xf32, #tpu.memory_space<vmem>>, vector<128x128xf32>
    %cst_8 = arith.constant dense<0.000000e+00> : vector<8x128xf32>
    %9 = tpu.matmul %7, %8, %cst_8 {dimension_numbers = #tpu.dot_dimension_numbers<[1], [0], [0], [1], [0, 0, 1, 1], [], []>} : vector<8x128xf32>, vector<128x128xf32>, vector<8x128xf32> -> vector<8x128xf32>
    %c0_9 = arith.constant 0 : index
    %c0_10 = arith.constant 0 : index
    %10 = vector.load %arg5[%c0_9, %c0_10] : memref<1x128xf32, #tpu.memory_space<vmem>>, vector<1x128xf32>
    %11 = vector.broadcast %10 : vector<1x128xf32> to vector<8x128xf32>
    %12 = arith.addf %9, %11 : vector<8x128xf32>
    %cst_11 = arith.constant 0.000000e+00 : f32
    %13 = vector.broadcast %cst_11 : f32 to vector<8x128xf32>
    %14 = arith.maximumf %12, %13 : vector<8x128xf32>
    %c0_12 = arith.constant 0 : index
    %c0_13 = arith.constant 0 : index
    %15 = vector.load %arg6[%c0_12, %c0_13] : memref<128x12xf32, #tpu.memory_space<vmem>>, vector<128x12xf32>
    %cst_14 = arith.constant dense<0.000000e+00> : vector<8x12xf32>
    %16 = tpu.matmul %14, %15, %cst_14 {dimension_numbers = #tpu.dot_dimension_numbers<[1], [0], [0], [1], [0, 0, 1, 1], [], []>} : vector<8x128xf32>, vector<128x12xf32>, vector<8x12xf32> -> vector<8x12xf32>
    %c0_15 = arith.constant 0 : index
    %c0_16 = arith.constant 0 : index
    %17 = vector.load %arg7[%c0_15, %c0_16] : memref<1x12xf32, #tpu.memory_space<vmem>>, vector<1x12xf32>
    %18 = vector.broadcast %17 : vector<1x12xf32> to vector<8x12xf32>
    %19 = arith.addf %16, %18 : vector<8x12xf32>
    %cst_17 = arith.constant dense<0xFF800000> : vector<8xf32>
    %20 = vector.multi_reduction <maximumf>, %19, %cst_17 [1] : vector<8x12xf32> to vector<8xf32>
    %21 = vector.shape_cast %20 : vector<8xf32> to vector<8x1xf32>
    %22 = vector.broadcast %21 : vector<8x1xf32> to vector<8x12xf32>
    %23 = arith.subf %19, %22 : vector<8x12xf32>
    %24 = math.exp %23 : vector<8x12xf32>
    %cst_18 = arith.constant dense<0.000000e+00> : vector<8xf32>
    %25 = vector.multi_reduction <add>, %24, %cst_18 [1] : vector<8x12xf32> to vector<8xf32>
    %26 = vector.shape_cast %25 : vector<8xf32> to vector<8x1xf32>
    %27 = math.log %26 : vector<8x1xf32>
    %28 = vector.broadcast %27 : vector<8x1xf32> to vector<8x12xf32>
    %29 = arith.subf %23, %28 : vector<8x12xf32>
    %c0_19 = arith.constant 0 : index
    %c0_20 = arith.constant 0 : index
    %30 = vector.load %arg8[%c0_19, %c0_20] : memref<8x12xf32, #tpu.memory_space<vmem>>, vector<8x12xf32>
    tpu.vector_store %arg8[%c0_19, %c0_20], %29 {strides = array<i32>} : memref<8x12xf32, #tpu.memory_space<vmem>>, vector<8x12xf32>,
    return
  }
  func.func @transform_0(%arg0: i32) -> (i32, i32) {
    %c0_i32 = arith.constant 0 : i32
    %c0_i32_0 = arith.constant 0 : i32
    return %arg0, %c0_i32 : i32, i32
  }
  func.func @transform_1(%arg0: i32) -> (i32, i32) {
    %c0_i32 = arith.constant 0 : i32
    %c0_i32_0 = arith.constant 0 : i32
    %c0_i32_1 = arith.constant 0 : i32
    return %c0_i32, %c0_i32_0 : i32, i32
  }
  func.func @transform_2(%arg0: i32) -> (i32, i32) {
    %c0_i32 = arith.constant 0 : i32
    %c0_i32_0 = arith.constant 0 : i32
    %c0_i32_1 = arith.constant 0 : i32
    return %c0_i32, %c0_i32_0 : i32, i32
  }
  func.func @transform_3(%arg0: i32) -> (i32, i32) {
    %c0_i32 = arith.constant 0 : i32
    %c0_i32_0 = arith.constant 0 : i32
    %c0_i32_1 = arith.constant 0 : i32
    return %c0_i32, %c0_i32_0 : i32, i32
  }
  func.func @transform_4(%arg0: i32) -> (i32, i32) {
    %c0_i32 = arith.constant 0 : i32
    %c0_i32_0 = arith.constant 0 : i32
    %c0_i32_1 = arith.constant 0 : i32
    return %c0_i32, %c0_i32_0 : i32, i32
  }
  func.func @transform_5(%arg0: i32) -> (i32, i32) {
    %c0_i32 = arith.constant 0 : i32
    %c0_i32_0 = arith.constant 0 : i32
    %c0_i32_1 = arith.constant 0 : i32
    return %c0_i32, %c0_i32_0 : i32, i32
  }
  func.func @transform_6(%arg0: i32) -> (i32, i32) {
    %c0_i32 = arith.constant 0 : i32
    %c0_i32_0 = arith.constant 0 : i32
    %c0_i32_1 = arith.constant 0 : i32
    return %c0_i32, %c0_i32_0 : i32, i32
  }
  func.func @transform_7(%arg0: i32) -> (i32, i32) {
    %c0_i32 = arith.constant 0 : i32
    %c0_i32_0 = arith.constant 0 : i32
    return %arg0, %c0_i32 : i32, i32
  }
}

</mosaic_0001>

<bundles_post_ra>
// kernel: tpu_custom_call.1
= control target key start
LH: loop header
LB: loop body
LE: loop exit
PB: predicated region body
PF: predicated region fallthrough
CT: control target
= control target key end

     0   :  { %12 = vsyncpa [#allocation3], 0  ;;  %s784_s0 = inlined_call_operand.vmem [shape: f32[8,32], index: 0, kind: input, shape index: {}]   ;;  %s785_s1 = inlined_call_operand.hbm [shape: f32[32,128], index: 1, kind: input, shape index: {}]   ;;  %s786_s2 = inlined_call_operand.vmem [shape: f32[1,128], index: 2, kind: input, shape index: {}]   ;;  %s787_s3 = inlined_call_operand.vmem [shape: f32[128,128], index: 3, kind: input, shape index: {}]   ;;  %s788_s4 = inlined_call_operand.vmem [shape: f32[1,128], index: 4, kind: input, shape index: {}]   ;;  %s789_s5 = inlined_call_operand.vmem [shape: f32[128,12], index: 5, kind: input, shape index: {}]   ;;  %s790_s6 = inlined_call_operand.vmem [shape: f32[1,12], index: 6, kind: input, shape index: {}]   ;;  %s791_s7 = inlined_call_operand.hbm [shape: f32[8,12], index: 7, kind: output, shape index: {}]  }
   0x1   :  { %13 = vsyncpa [#allocation4], 0  ;;  %s581_s24 = smov [#allocation2]   ;;  %s533_s28 = scalar_lea.hbm %s785_s1, 512 }
   0x2   :  { %s21_s25 = sshll.u32 %s581_s24, 4  ;;  %p534_p0 = scmp.ne.s32.totalorder %s785_s1, %s533_s28  ;;  %s22_s25 = int_to_ptr.vmem [resolvable:$true] %s21_s25 }
   0x3   :  { %p537_p1 = scmp.lt.u32.totalorder %s533_s28, %s785_s1 }
   0x5   :  { %p539_p2 = pnand %p537_p1, %p534_p0 }
   0x7   :  { %542 = shalt.err (!%p539_p2)
}
   0x8   :  { %s543_s10 = scalar_lea.vmem %s22_s25, 512  ;;  %p548_p4 = scmp.lt.s32.totalorder %s22_s25, %s22_s25 }
   0x9   :  { %p544_p3 = scmp.ne.s32.totalorder %s22_s25, %s543_s10  ;;  %p549_p5 = scmp.lt.s32.totalorder %s543_s10, %s543_s10 }
   0xb   :  { %p550_p6 = por %p549_p5, %p548_p4 }
   0xd   :  { %p551_p7 = pnand %p550_p6, %p544_p3 }
   0xf   :  { %554 = shalt.err (!%p551_p7)
}
  0x10   :  { %s582_s11 = smov 128   ;;  %s583_s12 = smov 8  }
  0x11   :  { %27 = dma.hbm_to_vmem [thread:$0]  %s785_s1, 512, %s22_s25, [#allocation3], %s582_s11, %s582_s11, %s583_s12  }
  0x12   :  { %577 = dma.done.wait [#allocation3], 512  }
  0x13   :  { %578 = vsyncadd [#allocation3], 4294966784  ;;  %v584_v0 = vmov 0.0|0.0   ;;  %vm585_vm0 = vmmov 0   ;;  %v586_v1 = vmov 0.0   ;;  %v42_v2 = vld [vmem:[#allocation2] sm:$0xff] }
  0x14   :  { %468 = vmatprep.subr.bf16.mxu0 %v584_v0  ;;  %395 = vmatprep.mubr.msk.f32.mxu0 %vm585_vm0, %v586_v1  ;;  %v43_v3 = vld [vmem:[#allocation2 + $0x8] sm:$0xff]  ;;  %v44_v4 = vld [vmem:[#allocation2 + $0x10] sm:$0xff]  ;;  %v45_v6 = vld [vmem:[#allocation2 + $0x18] sm:$0xff]  ;;  %vm53_vm1 = vcmask 261120   ;;  %vm315_vm2 = vcmask 97280  }
  0x15   :  { %474 = vmatprep.subr.bf16.mxu1 %v584_v0  ;;  %430 = vmatprep.mubr.msk.f32.mxu1 %vm585_vm0, %v586_v1  ;;  %v469_v5 = vpack.c.bf16 %v43_v3, %v42_v2  ;;  %v128_v7 = vld [vmem:[%s787_s3] sm:$0xff]  ;;  %v129_v8 = vld [vmem:[%s787_s3 + $0x8] sm:$0xff]  ;;  %v130_v9 = vld [vmem:[%s787_s3 + $0x10] sm:$0xff]  ;;  %v472_v11 = vpack.c.bf16 %v45_v6, %v44_v4 }
  0x16   :  { %v131_v10 = vld [vmem:[%s787_s3 + $0x18] sm:$0xff]  ;;  %v475_v12 = vpack.c.bf16 %v129_v8, %v128_v7  ;;  %v132_v14 = vld [vmem:[%s787_s3 + $0x20] sm:$0xff]  ;;  %v133_v15 = vld [vmem:[%s787_s3 + $0x28] sm:$0xff] }
  0x17   :  { %470 = vmatpush3.bf16.msra.mxu0 %v469_v5  ;;  %v478_v13 = vpack.c.bf16 %v131_v10, %v130_v9  ;;  %v41_v16 = vld [vmem:[%s784_s0] sm:$0xff]  ;;  %v481_v17 = vpack.c.bf16 %v133_v15, %v132_v14  ;;  %v134_v18 = vld [vmem:[%s787_s3 + $0x30] sm:$0xff]  ;;  %v135_v19 = vld [vmem:[%s787_s3 + $0x38] sm:$0xff] }
  0x18   :  { %471 = vmatprep.subr.bf16.mxu0 %v584_v0  ;;  %476 = vmatpush3.bf16.msra.mxu1 %v475_v12  ;;  %v484_v20 = vpack.c.bf16 %v135_v19, %v134_v18  ;;  %v136_v21 = vld [vmem:[%s787_s3 + $0x40] sm:$0xff]  ;;  %v137_v22 = vld [vmem:[%s787_s3 + $0x48] sm:$0xff]  ;;  %v138_v24 = vld [vmem:[%s787_s3 + $0x50] sm:$0xff] }
  0x19   :  { %477 = vmatprep.subr.bf16.mxu1 %v584_v0  ;;  %v487_v23 = vpack.c.bf16 %v137_v22, %v136_v21  ;;  %v139_v25 = vld [vmem:[%s787_s3 + $0x58] sm:$0xff]  ;;  %v140_v27 = vld [vmem:[%s787_s3 + $0x60] sm:$0xff]  ;;  %v141_v28 = vld [vmem:[%s787_s3 + $0x68] sm:$0xff] }
  0x1a   :  { %v490_v26 = vpack.c.bf16 %v139_v25, %v138_v24  ;;  %v493_v29 = vpack.c.bf16 %v141_v28, %v140_v27  ;;  %v142_v30 = vld [vmem:[%s787_s3 + $0x70] sm:$0xff]  ;;  %v143_v31 = vld [vmem:[%s787_s3 + $0x78] sm:$0xff]  ;;  %v222_v33 = vld [vmem:[%s789_s5] sm:$0xff] }
  0x1b   :  { %473 = vmatpush3.bf16.msra.mxu0 %v472_v11  ;;  %v496_v32 = vpack.c.bf16 %v143_v31, %v142_v30  ;;  %v223_v34 = vld [vmem:[%s789_s5 + $0x8] sm:$0xff]  ;;  %v224_v35 = vld [vmem:[%s789_s5 + $0x10] sm:$0xff]  ;;  %v225_v37 = vld [vmem:[%s789_s5 + $0x18] sm:$0xff] }
  0x1c   :  { %498 = vmatprep.subr.bf16.mxu0 %v584_v0  ;;  %479 = vmatpush3.bf16.msra.mxu1 %v478_v13  ;;  %v499_v36 = vpack.c.bf16 %v223_v34, %v222_v33  ;;  %v502_v38 = vpack.c.bf16 %v225_v37, %v224_v35  ;;  %v226_v39 = vld [vmem:[%s789_s5 + $0x20] sm:$0xff]  ;;  %v227_v40 = vld [vmem:[%s789_s5 + $0x28] sm:$0xff]  ;;  %v228_v42 = vld [vmem:[%s789_s5 + $0x30] sm:$0xff] }
  0x1d   :  { %480 = vmatprep.subr.bf16.mxu1 %v584_v0  ;;  %v505_v41 = vpack.c.bf16 %v227_v40, %v226_v39  ;;  %v229_v43 = vld [vmem:[%s789_s5 + $0x38] sm:$0xff]  ;;  %v230_v45 = vld [vmem:[%s789_s5 + $0x40] sm:$0xff]  ;;  %v231_v46 = vld [vmem:[%s789_s5 + $0x48] sm:$0xff] }
  0x1e   :  { %396 = vmatmul.mubr.msk.f32.vlgmr.msra.gmra.mrb[0].mxu0 %vm53_vm1, %v41_v16  ;;  %v508_v44 = vpack.c.bf16 %v229_v43, %v228_v42  ;;  %v511_v47 = vpack.c.bf16 %v231_v46, %v230_v45  ;;  %v232_v48 = vld [vmem:[%s789_s5 + $0x50] sm:$0xff]  ;;  %v233_v49 = vld [vmem:[%s789_s5 + $0x58] sm:$0xff]  ;;  %v234_v51 = vld [vmem:[%s789_s5 + $0x60] sm:$0xff] }
  0x1f   :  { %465 = vmatprep.mubr.msk.f32.mxu0 %vm585_vm0, %v586_v1  ;;  %500 = vmatpush3.bf16.msra.mxu0 %v499_v36  ;;  %v514_v50 = vpack.c.bf16 %v233_v49, %v232_v48  ;;  %v235_v52 = vld [vmem:[%s789_s5 + $0x68] sm:$0xff]  ;;  %v344_v54 = vld [vmem:[%s786_s2] ss:$0 sm:$0xff]  ;;  %v236_v59 = vld [vmem:[%s789_s5 + $0x70] sm:$0xff] }
  0x20   :  { %482 = vmatpush3.bf16.msra.mxu1 %v481_v17  ;;  %501 = vmatprep.subr.bf16.mxu0 %v584_v0  ;;  %v517_v53 = vpack.c.bf16 %v235_v52, %v234_v51  ;;  %v237_v60 = vld [vmem:[%s789_s5 + $0x78] sm:$0xff]  ;;  %v346_v62 = vld [vmem:[%s788_s4] ss:$0 sm:$0xff]  ;;  %s587_s4 = smov [#allocation5]  }
  0x21   :  { %483 = vmatprep.subr.bf16.mxu1 %v584_v0  ;;  %v520_v61 = vpack.c.bf16 %v237_v60, %v236_v59  ;;  %v347_v3 = vld [vmem:[%s790_s6] ss:$0 sm:$0xff]  ;;  %s335_s5 = sshll.u32 %s587_s4, 4  ;;  %s336_s5 = int_to_ptr.vmem [resolvable:$true] %s335_s5 }
  0x22   :  { %s555_s6 = scalar_lea.vmem %s336_s5, 128  ;;  %p560_p9 = scmp.lt.s32.totalorder %s336_s5, %s336_s5 }
  0x23   :  { %503 = vmatpush3.bf16.msra.mxu0 %v502_v38  ;;  %p556_p8 = scmp.ne.s32.totalorder %s336_s5, %s555_s6  ;;  %p561_p10 = scmp.lt.s32.totalorder %s555_s6, %s555_s6 }
  0x24   :  { %485 = vmatpush3.bf16.msra.mxu1 %v484_v20  ;;  %504 = vmatprep.subr.bf16.mxu0 %v584_v0 }
  0x25   :  { %486 = vmatprep.subr.bf16.mxu1 %v584_v0  ;;  %p562_p11 = por %p561_p10, %p560_p9 }
  0x27   :  { %506 = vmatpush3.bf16.msra.mxu0 %v505_v41  ;;  %p563_p12 = pnand %p562_p11, %p556_p8 }
  0x28   :  { %488 = vmatpush3.bf16.msra.mxu1 %v487_v23  ;;  %507 = vmatprep.subr.bf16.mxu0 %v584_v0 }
  0x29   :  { %489 = vmatprep.subr.bf16.mxu1 %v584_v0 }
  0x2b   :  { %509 = vmatpush3.bf16.msra.mxu0 %v508_v44 }
  0x2c   :  { %491 = vmatpush3.bf16.msra.mxu1 %v490_v26  ;;  %510 = vmatprep.subr.bf16.mxu0 %v584_v0 }
  0x2d   :  { %492 = vmatprep.subr.bf16.mxu1 %v584_v0 }
  0x2f   :  { %512 = vmatpush3.bf16.msra.mxu0 %v511_v47 }
  0x30   :  { %494 = vmatpush3.bf16.msra.mxu1 %v493_v29  ;;  %513 = vmatprep.subr.bf16.mxu0 %v584_v0 }
  0x31   :  { %495 = vmatprep.subr.bf16.mxu1 %v584_v0 }
  0x33   :  { %515 = vmatpush3.bf16.msra.mxu0 %v514_v50 }
  0x34   :  { %497 = vmatpush3.bf16.msra.mxu1 %v496_v32  ;;  %516 = vmatprep.subr.bf16.mxu0 %v584_v0 }
  0x37   :  { %518 = vmatpush3.bf16.msra.mxu0 %v517_v53 }
  0x38   :  { %519 = vmatprep.subr.bf16.mxu0 %v584_v0 }
  0x3b   :  { %521 = vmatpush3.bf16.msra.mxu0 %v520_v61 }
  0xf1   :  { %v123_v55 = vpop.f32.mrb[0].mxu0 }
  0xf2   :  { %v124_v56 = vadd.f32 %v344_v54, %v123_v55  ;;  %v397_v57 = vpop.f32.mrb[1].mxu0 }
  0xf4   :  { %v127_v58 = vmax.f32 %v124_v56, 0.0 }
  0xf6   :  { %431 = vmatmul.mubr.f32.vlgmr.msra.gmra.mrb[0].mxu1 %v127_v58 }
 0x1c9   :  { %v217_v63 = vpop.f32.mrb[0].mxu1 }
 0x1ca   :  { %v218_v0 = vadd.f32 %v346_v62, %v217_v63  ;;  %v432_v1 = vpop.f32.mrb[1].mxu1 }
 0x1cc   :  { %v221_v2 = vmax.f32 %v218_v0, 0.0 }
 0x1ce   :  { %466 = vmatmul.mubr.f32.vlgmr.msra.gmra.mrb[2].mxu0 %v221_v2 }
 0x2a1   :  { %v311_v4 = vpop.f32.mrb[2].mxu0 }
 0x2a2   :  { %v312_v5 = vadd.f32 %v347_v3, %v311_v4  ;;  %v467_v6 = vpop.f32.mrb[3].mxu0 }
 0x2a4   :  { %v316_v7 = vsel %vm315_vm2, %v312_v5, -inf }
 0x2a5   :  { %317 = vmax.xlane.f32.xlu0 %v316_v7 }
 0x332   :  { %v318_v8 = vpop.xlane.xlu0 %317 }
 0x333   :  { %v319_v9 = vsub.f32 %v312_v5, %v318_v8 }
 0x335   :  { %v320_v10 = vmul.f32 1.442695, %v319_v9 }
 0x337   :  { %529 = vpow2.f32 %v320_v10 }
 0x341   :  { %v530_v11 = vpop.eup %529 }
 0x342   :  { %v322_v12 = vsel %vm315_vm2, %v530_v11, 0.0 }
 0x343   :  { %323 = vadd.xlane.f32.xlu0 %v322_v12 }
 0x3d0   :  { %v324_v13 = vpop.xlane.xlu0 %323 }
 0x3d1   :  { %531 = vlog2.f32 %v324_v13 }
 0x3db   :  { %v532_v14 = vpop.eup %531 }
 0x3dc   :  { %v326_v15 = vmul.f32 0.6931472, %v532_v14 }
 0x3de   :  { %v327_v16 = vsub.f32 %v319_v9, %v326_v15 }
 0x3e0   :  { %328 = vst.msk [vmem:[#allocation5] sm:$0xff] %vm315_vm2, %v327_v16 }
 0x3e1   :  { %566 = shalt.err (!%p563_p12)
}
 0x3e2   :  { %s567_s11 = scalar_lea.hbm %s791_s7, 128 }
 0x3e3   :  { %p568_p13 = scmp.ne.s32.totalorder %s791_s7, %s567_s11  ;;  %p571_p0 = scmp.lt.u32.totalorder %s567_s11, %s791_s7 }
 0x3e5   :  { %p573_p1 = pnand %p571_p0, %p568_p13 }
 0x3e7   :  { %576 = shalt.err (!%p573_p1)
}
 0x3e8   :  { %338 = dma.vmem_to_hbm [thread:$0]  %s336_s5, 128, %s791_s7, [#allocation4]  }
 0x3e9   :  { %579 = dma.done.wait [#allocation4], 128  }
 0x3ea   :  { %580 = vsyncadd [#allocation4], 4294967168 }
 0x3eb   :  { %342 = vsyncpa [#allocation3], 1 }
 0x3ec   :  { %343 = vsyncpa [#allocation4], 1 }

</bundles_post_ra>
